<compile_context>
chip_gen: v5e
topology: v5e:2x2
jax: 0.10.0
libtpu: 0.0.40
codegen_flags: <defaults>
</compile_context>

<pallas_src>
import functools

import numpy as np
import jax
import jax.numpy as jnp
from jax import lax
from jax.experimental import pallas as pl
from jax.experimental.pallas import tpu as pltpu


def _round_up(a, m):
    return (a + m - 1) // m * m


def _vmem_capacity_bytes():
    try:
        return int(pltpu.get_tpu_info().vmem_capacity_bytes)
    except Exception:
        return 64 << 20          # conservative fallback (v7x per-core VMEM)


def _pick_row_tile(n_patches, kp, e, out_bytes):
    """Choose the row (patch) tile TP and the padded patch count.

    TP is VMEM-aware (double-buffered xp/pos/out blocks + the resident weight
    must fit with headroom on every generation) and MXU-friendly (prefer
    512/256/128, always a multiple of 16 for bf16 sublane packing).  For
    divisor-unfriendly patch counts we pad the patch axis instead of falling
    back to a degenerate tile.  Returns (TP, padded_n_patches).
    """
    budget = int(_vmem_capacity_bytes() * 0.55)          # headroom for scratch
    fixed = 2 * kp * e * 2                               # double-buffered weight
    per_row = 2 * (kp * 2 + e * 4 + e * out_bytes)       # xp + pos + out blocks
    cap = max(16, (budget - fixed) // per_row)
    cap = min(cap, 1024)
    cap -= cap % 16

    for t in (512, 256, 128):                            # MXU-native exact divisors
        if t <= cap and n_patches % t == 0:
            return t, n_patches
    top = min(cap, n_patches - n_patches % 16)
    for t in range(top, 15, -16):                        # largest 16-multiple divisor
        if n_patches % t == 0:
            return t, n_patches
    if n_patches <= cap:                                 # tiny / odd patch count
        tp = _round_up(n_patches, 16)
        return tp, tp
    tp = min(cap, 256)                                   # awkward large: pad to TP
    return tp, _round_up(n_patches, tp)


def _embeddings_kernel(xp_ref, w_ref, pos_ref, out_ref):
    # xp_ref : (TP, Kp)  bf16   patch pixels for this row tile
    # w_ref  : (Kp, E)   bf16   folded Conv3d weight (VMEM-resident)
    # pos_ref: (TP, E)   f32    position embeddings + folded bias for this tile
    # out_ref: (TP, E)          lane-dense output tile
    y = jnp.dot(xp_ref[...], w_ref[...], preferred_element_type=jnp.float32)
    out_ref[...] = (y + pos_ref[...]).astype(out_ref.dtype)
    # TODO(synk): nn.Dropout is modeled as eval-mode identity; training-mode
    # random masking would need pltpu.prng_seed/prng_random_bits + a seed operand.


def embeddings_forward(x, w, b, pos, *, patch_size, out_dtype=jnp.float32):
    """x: (N, Cin, D, H, W) f32; w: (E, Cin, p, p, p); b: (E,);
    pos: (1, n_patches, E).  Returns (N, n_patches, E) in `out_dtype`."""
    N, Cin, D, H, W = x.shape
    p = patch_size
    E = w.shape[0]
    Dp, Hp, Wp = D // p, H // p, W // p
    n_patches = Dp * Hp * Wp
    K = Cin * p * p * p

    # ---- glue: non-overlapping patch extraction (indexing only, no FLOPs) ----
    xp = x.reshape(N, Cin, Dp, p, Hp, p, Wp, p)
    xp = jnp.transpose(xp, (0, 2, 4, 6, 1, 3, 5, 7))      # N,Dp,Hp,Wp,Cin,pd,ph,pw
    xp = xp.reshape(N, n_patches, K).astype(jnp.bfloat16)
    # TODO(synk): this materializes a bf16 copy of x in HBM; fusing the layout
    # op into the pallas_call operand (allow_input_fusion) would cut that pass.

    w_k = w.reshape(E, K).T.astype(jnp.bfloat16)           # (K, E)
    # fold the Conv3d bias into the position embeddings (one wrapper-side add)
    pos_k = (pos.reshape(n_patches, E) + b[None, :]).astype(jnp.float32)

    # pad the contraction dim to a lane multiple (zero rows are numerically free)
    Kp = _round_up(K, 128)
    if Kp != K:
        xp = jnp.pad(xp, ((0, 0), (0, 0), (0, Kp - K)))
        w_k = jnp.pad(w_k, ((0, Kp - K), (0, 0)))

    out_b = np.dtype(out_dtype).itemsize
    TP, np_pad = _pick_row_tile(n_patches, Kp, E, out_b)
    if np_pad != n_patches:
        xp = jnp.pad(xp, ((0, 0), (0, np_pad - n_patches), (0, 0)))
        pos_k = jnp.pad(pos_k, ((0, np_pad - n_patches), (0, 0)))

    # collapse (batch, patch) into one row axis: bigger MXU M dim, fewer grid
    # steps, weight/pos genuinely resident across batches.
    rows = N * np_pad
    # give both v7x TensorCores work: at least 2 grid steps when possible
    while rows // TP < 2 and TP >= 32 and TP % 32 == 0:
        TP //= 2
    xp = xp.reshape(rows, Kp)
    tiles_per_batch = np_pad // TP
    grid = (rows // TP,)

    if tiles_per_batch == 1:
        pos_map = lambda r: (0, 0)                         # invariant -> resident
    else:
        pos_map = lambda r: (r % tiles_per_batch, 0)

    needed = 2 * Kp * E * 2 + TP * 2 * (Kp * 2 + E * 4 + E * out_b)
    vmem_limit = min(max(32 << 20, needed + (2 << 20)), _vmem_capacity_bytes())

    out = pl.pallas_call(
        _embeddings_kernel,
        out_shape=jax.ShapeDtypeStruct((rows, E), out_dtype),
        grid=grid,
        in_specs=[
            pl.BlockSpec((TP, Kp), lambda r: (r, 0)),      # patch rows
            pl.BlockSpec((Kp, E), lambda r: (0, 0)),       # folded weight
            pl.BlockSpec((TP, E), pos_map),                # pos + bias
        ],
        out_specs=pl.BlockSpec((TP, E), lambda r: (r, 0)),
        compiler_params=pltpu.CompilerParams(
            dimension_semantics=("parallel",),
            vmem_limit_bytes=int(vmem_limit)),
    )(xp, w_k, pos_k)

    out = out.reshape(N, np_pad, E)
    if np_pad != n_patches:
        out = out[:, :n_patches]
    return out


def embeddings_reference(x, w, b, pos, *, patch_size):
    """Pure-JAX reference matching the PyTorch module (eval-mode dropout)."""
    y = lax.conv_general_dilated(
        x, w, (patch_size,) * 3, [(0, 0)] * 3,
        dimension_numbers=("NCDHW", "OIDHW", "NCDHW"),
        precision=lax.Precision.HIGHEST)
    y = y + b[None, :, None, None, None]
    N, E = y.shape[0], y.shape[1]
    y = y.reshape(N, E, -1)
    y = jnp.transpose(y, (0, 2, 1))                        # (N, n_patches, E)
    return y + pos


if __name__ == "__main__":
    key = jax.random.PRNGKey(0)
    # small shapes consistent with the module: cube_size=(16,16,16), patch=4
    N, Cin, D, H, W = 2, 4, 16, 16, 16
    patch = 4
    E = 128                                   # embed_dim (lane-dense last dim)
    n_patches = (D // patch) * (H // patch) * (W // patch)

    k1, k2, k3, k4 = jax.random.split(key, 4)
    x = jax.random.normal(k1, (N, Cin, D, H, W), jnp.float32)
    w = jax.random.normal(k2, (E, Cin, patch, patch, patch), jnp.float32) * 0.02
    b = jax.random.normal(k3, (E,), jnp.float32) * 0.02
    # the module initializes position_embeddings to zeros; use random values
    # here so the "+ pos" path is actually exercised by the check
    pos = jax.random.normal(k4, (1, n_patches, E), jnp.float32) * 0.02

    fwd = jax.jit(functools.partial(embeddings_forward, patch_size=patch))
    out = jax.block_until_ready(fwd(x, w, b, pos))

    ref = embeddings_reference(x, w, b, pos, patch_size=patch)
    assert out.shape == (N, n_patches, E), out.shape
    max_err = float(jnp.max(jnp.abs(out - ref)))
    assert jnp.allclose(out, ref, rtol=1e-2, atol=1e-2), max_err
    print("KERNEL_OK")
</pallas_src>

<mosaic_0001>
module attributes {stable_mosaic.version = 11 : i64} {
  func.func @_embeddings_kernel(%arg0: i32, %arg1: memref<64x256xbf16, #tpu.memory_space<vmem>>, %arg2: memref<256x128xbf16, #tpu.memory_space<vmem>>, %arg3: memref<64x128xf32, #tpu.memory_space<vmem>>, %arg4: memref<64x128xf32, #tpu.memory_space<vmem>>) attributes {dimension_semantics = [#tpu.dimension_semantics<parallel>], iteration_bounds = array<i64: 2>, scalar_prefetch = 0 : i64, scratch_operands = 0 : i64, tpu.core_type = #tpu.core_type<tc>, window_params = [{transform_indices = @transform_0, window_bounds = array<i64: 64, 256>}, {pipeline_mode = #tpu.pipeline_mode<synchronous>, transform_indices = @transform_1, window_bounds = array<i64: 256, 128>}, {pipeline_mode = #tpu.pipeline_mode<synchronous>, transform_indices = @transform_2, window_bounds = array<i64: 64, 128>}, {transform_indices = @transform_3, window_bounds = array<i64: 64, 128>}]} {
    %c0 = arith.constant 0 : index
    %c0_0 = arith.constant 0 : index
    %0 = vector.load %arg1[%c0, %c0_0] : memref<64x256xbf16, #tpu.memory_space<vmem>>, vector<64x256xbf16>
    %c0_1 = arith.constant 0 : index
    %c0_2 = arith.constant 0 : index
    %1 = vector.load %arg2[%c0_1, %c0_2] : memref<256x128xbf16, #tpu.memory_space<vmem>>, vector<256x128xbf16>
    %cst = arith.constant dense<0.000000e+00> : vector<64x128xf32>
    %2 = tpu.matmul %0, %1, %cst {dimension_numbers = #tpu.dot_dimension_numbers<[1], [0], [0], [1], [0, 0, 1, 1], [], []>} : vector<64x256xbf16>, vector<256x128xbf16>, vector<64x128xf32> -> vector<64x128xf32>
    %c0_3 = arith.constant 0 : index
    %c0_4 = arith.constant 0 : index
    %3 = vector.load %arg3[%c0_3, %c0_4] : memref<64x128xf32, #tpu.memory_space<vmem>>, vector<64x128xf32>
    %4 = arith.addf %2, %3 : vector<64x128xf32>
    %c0_5 = arith.constant 0 : index
    %c0_6 = arith.constant 0 : index
    %5 = vector.load %arg4[%c0_5, %c0_6] : memref<64x128xf32, #tpu.memory_space<vmem>>, vector<64x128xf32>
    tpu.vector_store %arg4[%c0_5, %c0_6], %4 {strides = array<i32>} : memref<64x128xf32, #tpu.memory_space<vmem>>, vector<64x128xf32>,
    return
  }
  func.func @transform_0(%arg0: i32) -> (i32, i32) {
    %c0_i32 = arith.constant 0 : i32
    %c0_i32_0 = arith.constant 0 : i32
    return %arg0, %c0_i32 : i32, i32
  }
  func.func @transform_1(%arg0: i32) -> (i32, i32) {
    %c0_i32 = arith.constant 0 : i32
    %c0_i32_0 = arith.constant 0 : i32
    %c0_i32_1 = arith.constant 0 : i32
    return %c0_i32, %c0_i32_0 : i32, i32
  }
  func.func @transform_2(%arg0: i32) -> (i32, i32) {
    %c0_i32 = arith.constant 0 : i32
    %c0_i32_0 = arith.constant 0 : i32
    %c0_i32_1 = arith.constant 0 : i32
    return %c0_i32, %c0_i32_0 : i32, i32
  }
  func.func @transform_3(%arg0: i32) -> (i32, i32) {
    %c0_i32 = arith.constant 0 : i32
    %c0_i32_0 = arith.constant 0 : i32
    return %arg0, %c0_i32 : i32, i32
  }
}

</mosaic_0001>

<bundles_post_ra>
// kernel: embeddings_forward.1
= control target key start
LH: loop header
LB: loop body
LE: loop exit
PB: predicated region body
PF: predicated region fallthrough
CT: control target
= control target key end

     0   :  { %8 = vsyncpa [#allocation3], 0  ;;  %s970_s0 = inlined_call_operand.vmem [shape: bf16[128,256], index: 0, kind: input, shape index: {}]   ;;  %s971_s1 = inlined_call_operand.vmem [shape: bf16[256,128], index: 1, kind: input, shape index: {}]   ;;  %s972_s2 = inlined_call_operand.vmem [shape: f32[64,128], index: 2, kind: input, shape index: {}]   ;;  %s973_s3 = inlined_call_operand.hbm [shape: f32[128,128], index: 3, kind: output, shape index: {}]  }
   0x1   :  { %10 = vsyncpa [#allocation3 + $0x1], 0  ;;  %s781_s12 = smov 0   ;;  %s783_s13 = smov 0  }
   0x2   :  { %s785_s14 = smov 0   ;;  %s787_s15 = smov 0  }
   0x3 LB: > { %s802_s16 = sadd.s32 4294967295, %s757_s15   ;;  %s503_s17 = sadd.s32 4294967294, %s757_s15   ;;  %s757_s15 = sphi %s787_s15, %s979_s15   ;;  %s753_s14 = sphi %s785_s14, %s978_s14   ;;  %s749_s13 = sphi %s783_s13, %s977_s13   ;;  %s745_s12 = sphi %s781_s12, %s976_s12  }
   0x4   : > { %s806_s18 = sadd.s32 1, %s757_s15   ;;  %s91_s19 = sadd.s32 1, %s753_s14 }
   0x5   : > { %s88_s20 = ssub.s32 %s757_s15, %s806_s18  ;;  %p101_p0 = scmp.ne.s32.totalorder %s753_s14, %s749_s13 }
   0x6   : > { %p89_p1 = scmp.eq.s32.totalorder %s88_s20, 0  ;;  %p102_p2 = scmp.eq.s32.totalorder %s802_s16, 1 }
   0x7   : > { %p107_p3 = scmp.ne.s32.totalorder %s749_s13, %s745_s12  ;;  %p108_p4 = scmp.eq.s32.totalorder %s503_s17, 1 }
   0x8   : > { %s817_s21 = scalar_select %p89_p1, %s753_s14, %s91_s19  }
   0x9   : > { %p819_p5 = por %p102_p2, %p101_p0  ;;  %p823_p6 = por %p108_p4, %p107_p3 }
   0xa   : > { %p506_p7 = scmp.ge.s32.totalorder %s757_s15, 1  ;;  %p142_p8 = scmp.lt.s32.totalorder %s757_s15, 3 }
   0xc   : > { %p143_p9 = pnand %p506_p7, %p142_p8 }
   0xd   : > { %s508_s9 = sshll.u32 (!%p143_p9), %s802_s16, 3  ;;  %s164_s25 = sand.u32 (!%p143_p9), 1, %s749_s13  }
   0xe   : > { %146 = sbr.rel (%p143_p9) target bundleno = 215 (0xd7), region = 32  ;;  %p168_p10 = scmp.lt.s32.totalorder (!%p143_p9), %s508_s9, 15 }
   0xf   : > { %s507_s28 = sshll.u32 (!%p143_p9), %s164_s25, 6  ;;  %s637_s24 = sshll.u32 (!%p143_p9), %s802_s16, 6 }
  0x10   : > { %s426_s6 = scalar_lea.sflag (!%p143_p9), [#allocation3], %s164_s25  ;;  %s715_s11 = scalar_lea.hbm (!%p143_p9), %s973_s3, 128 }
  0x13   : > { %v628_v0 = vld [vmem:[%s971_s1 + $0x38] sm:$0xff]  ;;  %v627_v2 = vld [vmem:[%s971_s1 + $0x30] sm:$0xff]  ;;  %v626_v4 = vld [vmem:[%s971_s1 + $0x28] sm:$0xff]  ;;  %s981_s9 = smov (!%p168_p10, %s508_s9), 15 }
  0x14   : > { %v636_v1 = vld [vmem:[%s971_s1 + $0x78] sm:$0xff]  ;;  %359 = vmatpush.bf16.msra.mxu0 %v628_v0  ;;  %638 = vmatpush.bf16.msra.mxu2 %v628_v0  ;;  %v635_v3 = vld [vmem:[%s971_s1 + $0x70] sm:$0xff]  ;;  %v634_v5 = vld [vmem:[%s971_s1 + $0x68] sm:$0xff]  ;;  %s612_s4 = sshll.u32 %s981_s9, 3 }
  0x15   : > { %388 = vmatpush.bf16.msra.mxu1 %v636_v1  ;;  %646 = vmatpush.bf16.msra.mxu3 %v636_v1  ;;  %v625_v6 = vld [vmem:[%s971_s1 + $0x20] sm:$0xff]  ;;  %v624_v8 = vld [vmem:[%s971_s1 + $0x18] sm:$0xff]  ;;  %v623_v10 = vld [vmem:[%s971_s1 + $0x10] sm:$0xff]  ;;  %s872_s10 = scalar_lea.vmem %s970_s0, %s612_s4  ;;  %s908_s4 = scalar_lea.vmem [#allocation2], %s507_s28 }
  0x16   : > { %v633_v7 = vld [vmem:[%s971_s1 + $0x60] sm:$0xff]  ;;  %v632_v9 = vld [vmem:[%s971_s1 + $0x58] sm:$0xff]  ;;  %v631_v11 = vld [vmem:[%s971_s1 + $0x50] sm:$0xff]  ;;  %s437_s28 = scalar_lea.hbm %s973_s3, %s637_s24  ;;  %s438_s5 = sshll.u32 %s908_s4, 4  ;;  %s439_s5 = int_to_ptr.vmem [resolvable:$true] %s438_s5 }
  0x17   : > { %v622_v12 = vld [vmem:[%s971_s1 + $0x8] sm:$0xff]  ;;  %v621_v14 = vld [vmem:[%s971_s1] sm:$0xff]  ;;  %v521_v28 = vld [vmem:[%s872_s10 + $0x10] sm:$0xf]  ;;  %s440_s16 = sshll.u32 %s437_s28, 4  ;;  %s441_s16 = int_to_ptr.hbm [resolvable:$true] %s440_s16 }
  0x18   : > { %360 = vmatpush.bf16.msra.mxu0 %v627_v2  ;;  %639 = vmatpush.bf16.msra.mxu2 %v627_v2  ;;  %v630_v13 = vld [vmem:[%s971_s1 + $0x48] sm:$0xff]  ;;  %v629_v15 = vld [vmem:[%s971_s1 + $0x40] sm:$0xff]  ;;  %v616_v29 = vld [vmem:[%s872_s10 + $0x14] sm:$0xf0]  ;;  %s709_s7 = sshra.s32 %s441_s16, 4  ;;  %s710_s7 = int_to_ptr.hbm [resolvable:$true] %s709_s7 }
  0x19   : > { %389 = vmatpush.bf16.msra.mxu1 %v635_v3  ;;  %647 = vmatpush.bf16.msra.mxu3 %v635_v3  ;;  %v513_v16 = vld [vmem:[%s872_s10] sm:$0xf]  ;;  %v614_v17 = vld [vmem:[%s872_s10 + $0x4] sm:$0xf0]  ;;  %v613_v20 = vld [vmem:[%s872_s10 + $0x4] sm:$0xf]  ;;  %v522_v36 = vor.u32 %v616_v29, %v521_v28  ;;  %p716_p0 = scmp.lt.s32.totalorder %s710_s7, %s973_s3 }
  0x1a   : > { %v529_v18 = vld [vmem:[%s872_s10 + $0x20] sm:$0xf]  ;;  %v618_v19 = vld [vmem:[%s872_s10 + $0x24] sm:$0xf0]  ;;  %v515_v21 = vld [vmem:[%s872_s10 + $0x8] sm:$0xf0]  ;;  %v514_v24 = vor.u32 %v614_v17, %v513_v16 }
  0x1b   : > { %v617_v22 = vld [vmem:[%s872_s10 + $0x24] sm:$0xf]  ;;  %v531_v23 = vld [vmem:[%s872_s10 + $0x28] sm:$0xf0]  ;;  %v530_v25 = vor.u32 %v618_v19, %v529_v18  ;;  %v518_v26 = vor.u32 %v613_v20, %v515_v21  ;;  %v537_v30 = vld [vmem:[%s872_s10 + $0x30] sm:$0xf] }
  0x1c   : > { %361 = vmatpush.bf16.msra.mxu0 %v626_v4  ;;  %640 = vmatpush.bf16.msra.mxu2 %v626_v4  ;;  %v534_v27 = vor.u32 %v617_v22, %v531_v23  ;;  %v620_v31 = vld [vmem:[%s872_s10 + $0x34] sm:$0xf0]  ;;  %v615_v32 = vld [vmem:[%s872_s10 + $0x14] sm:$0xf]  ;;  %v523_v33 = vld [vmem:[%s872_s10 + $0x18] sm:$0xf0] }
  0x1d   : > { %390 = vmatpush.bf16.msra.mxu1 %v634_v5  ;;  %648 = vmatpush.bf16.msra.mxu3 %v634_v5  ;;  %v619_v34 = vld [vmem:[%s872_s10 + $0x34] sm:$0xf]  ;;  %v539_v35 = vld [vmem:[%s872_s10 + $0x38] sm:$0xf0]  ;;  %v538_v37 = vor.u32 %v620_v31, %v537_v30  ;;  %v526_v38 = vor.u32 %v615_v32, %v523_v33  ;;  %v215_v40 = vld [vmem:[%s972_s2] sm:$0xff]  ;;  %s711_s8 = scalar_lea.hbm %s710_s7, 64 }
  0x1e   : > { %v542_v39 = vor.u32 %v619_v34, %v539_v35  ;;  %v219_v45 = vld [vmem:[%s972_s2 + $0x20] sm:$0xff]  ;;  %v216_v47 = vld [vmem:[%s972_s2 + $0x8] sm:$0xff]  ;;  %v217_v57 = vld [vmem:[%s972_s2 + $0x10] sm:$0xff]  ;;  %p712_p11 = scmp.ne.s32.totalorder %s710_s7, %s711_s8  ;;  %p717_p1 = scmp.lt.s32.totalorder %s715_s11, %s711_s8 }
  0x1f   : > { %v220_v55 = vld [vmem:[%s972_s2 + $0x28] sm:$0xff]  ;;  %v221_v1 = vld [vmem:[%s972_s2 + $0x30] sm:$0xff]  ;;  %v218_v3 = vld [vmem:[%s972_s2 + $0x18] sm:$0xff] }
  0x20   : > { %362 = vmatpush.bf16.msra.mxu0 %v625_v6  ;;  %641 = vmatpush.bf16.msra.mxu2 %v625_v6  ;;  %p713_p12 = pnand %p712_p11, %p819_p5  ;;  %p718_p2 = por %p717_p1, %p716_p0 }
  0x21   : > { %391 = vmatpush.bf16.msra.mxu1 %v633_v7  ;;  %649 = vmatpush.bf16.msra.mxu3 %v633_v7 }
  0x22   : > { %p714_p13 = pneg %p713_p12 }
  0x24   : > { %363 = vmatpush.bf16.msra.mxu0 %v624_v8  ;;  %642 = vmatpush.bf16.msra.mxu2 %v624_v8  ;;  %p719_p3 = pnand %p718_p2, %p714_p13 }
  0x25   : > { %392 = vmatpush.bf16.msra.mxu1 %v632_v9  ;;  %650 = vmatpush.bf16.msra.mxu3 %v632_v9 }
  0x28   : > { %364 = vmatpush.bf16.msra.mxu0 %v623_v10  ;;  %643 = vmatpush.bf16.msra.mxu2 %v623_v10 }
  0x29   : > { %393 = vmatpush.bf16.msra.mxu1 %v631_v11  ;;  %651 = vmatpush.bf16.msra.mxu3 %v631_v11  ;;  %v222_v11 = vld [vmem:[%s972_s2 + $0x38] sm:$0xff] }
  0x2c   : > { %365 = vmatpush.bf16.msra.mxu0 %v622_v12  ;;  %644 = vmatpush.bf16.msra.mxu2 %v622_v12 }
  0x2d   : > { %394 = vmatpush.bf16.msra.mxu1 %v630_v13  ;;  %652 = vmatpush.bf16.msra.mxu3 %v630_v13 }
  0x30   : > { %366 = vmatpush.bf16.msra.mxu0 %v621_v14  ;;  %645 = vmatpush.bf16.msra.mxu2 %v621_v14 }
  0x31   : > { %395 = vmatpush.bf16.msra.mxu1 %v629_v15  ;;  %653 = vmatpush.bf16.msra.mxu3 %v629_v15 }
  0x33   : > { %367 = vmatmul.bf16.vlgmr.msra.gmra.mxu0 %v514_v24  ;;  %377 = vmatmul.bf16.vlgmr.msra.gmra.mxu2 %v530_v25 }
  0x34   : > { %396 = vmatmul.bf16.vlgmr.msra.gmra.mxu1 %v518_v26  ;;  %406 = vmatmul.bf16.vlgmr.msra.gmra.mxu3 %v534_v27 }
  0x43   : > { %372 = vmatmul.bf16.gmra.mxu0 %v522_v36  ;;  %382 = vmatmul.bf16.gmra.mxu2 %v538_v37 }
  0x44   : > { %401 = vmatmul.bf16.gmra.mxu1 %v526_v38  ;;  %411 = vmatmul.bf16.gmra.mxu3 %v542_v39 }
  0xb0   : > { %v368_v41 = vpop.f32.mrf.mxu0 }
  0xb1   : > { %v369_v42 = vadd.f32 %v368_v41, %v215_v40  ;;  %v397_v43 = vpop.f32.mrf.mxu1 }
  0xb3   : > { %v398_v44 = vadd.f32 %v397_v43, %v369_v42 }
  0xb5   : > { %417 = vst [vmem:[%s908_s4] sm:$0xff] %v398_v44 }
  0xb6   : > { %v378_v46 = vpop.f32.mrf.mxu2 }
  0xb7   : > { %v379_v48 = vadd.f32 %v378_v46, %v219_v45  ;;  %v407_v49 = vpop.f32.mrf.mxu3 }
  0xb8   : > { %v370_v50 = vpop.f32.mrf.mxu0 }
  0xb9   : > { %v408_v51 = vadd.f32 %v407_v49, %v379_v48  ;;  %v371_v52 = vadd.f32 %v370_v50, %v216_v47  ;;  %v399_v53 = vpop.f32.mrf.mxu1 }
  0xbb   : > { %421 = vst [vmem:[%s908_s4 + $0x20] sm:$0xff] %v408_v51  ;;  %v400_v54 = vadd.f32 %v399_v53, %v371_v52 }
  0xbd   : > { %418 = vst [vmem:[%s908_s4 + $0x8] sm:$0xff] %v400_v54 }
  0xbe   : > { %v380_v56 = vpop.f32.mrf.mxu2 }
  0xbf   : > { %v381_v58 = vadd.f32 %v380_v56, %v220_v55  ;;  %v409_v59 = vpop.f32.mrf.mxu3 }
  0xc0   : > { %v373_v60 = vpop.f32.mrf.mxu0 }
  0xc1   : > { %v410_v61 = vadd.f32 %v409_v59, %v381_v58  ;;  %v374_v62 = vadd.f32 %v373_v60, %v217_v57  ;;  %v402_v63 = vpop.f32.mrf.mxu1 }
  0xc3   : > { %422 = vst [vmem:[%s908_s4 + $0x28] sm:$0xff] %v410_v61  ;;  %v403_v0 = vadd.f32 %v402_v63, %v374_v62 }
  0xc5   : > { %419 = vst [vmem:[%s908_s4 + $0x10] sm:$0xff] %v403_v0 }
  0xc6   : > { %v383_v2 = vpop.f32.mrf.mxu2 }
  0xc7   : > { %v384_v4 = vadd.f32 %v383_v2, %v221_v1  ;;  %v412_v5 = vpop.f32.mrf.mxu3 }
  0xc8   : > { %v375_v6 = vpop.f32.mrf.mxu0 }
  0xc9   : > { %v413_v7 = vadd.f32 %v412_v5, %v384_v4  ;;  %v376_v8 = vadd.f32 %v375_v6, %v218_v3  ;;  %v404_v9 = vpop.f32.mrf.mxu1 }
  0xcb   : > { %423 = vst [vmem:[%s908_s4 + $0x30] sm:$0xff] %v413_v7  ;;  %v405_v10 = vadd.f32 %v404_v9, %v376_v8 }
  0xcd   : > { %420 = vst [vmem:[%s908_s4 + $0x18] sm:$0xff] %v405_v10 }
  0xce   : > { %v385_v12 = vpop.f32.mrf.mxu2 }
  0xcf   : > { %v386_v13 = vadd.f32 %v385_v12, %v222_v11  ;;  %v414_v14 = vpop.f32.mrf.mxu3 }
  0xd1   : > { %v415_v15 = vadd.f32 %v414_v14, %v386_v13 }
  0xd3   : > { %424 = vst [vmem:[%s908_s4 + $0x38] sm:$0xff] %v415_v15 }
  0xd4   : > { %722 = shalt.err (!%p719_p3)
}
  0xd5   : > { %s759_s25 = smov 128   ;;  %s760_s4 = smov 8  }
  0xd6   : > { %654 = dma.vmem_to_hbm [thread:$0]  (%p819_p5), %s439_s5, 1024, %s441_s16, %s426_s6, %s759_s25, %s759_s25, %s760_s4  }
  0xd7 PF: > { %p660_p4 = scmp.ge.s32.totalorder %s757_s15, 2  ;;  %s455_s20 = sand.u32 1, %s745_s12  }
  0xd8   : > { %s456_s24 = scalar_lea.sflag [#allocation3], %s455_s20 }
  0xd9   : > { %p657_p7 = pnand %p660_p4, %p823_p6 }
  0xdb   : > { %p658_p8 = pneg %p657_p7 }
  0xdd   : > { %740 = dma.done.wait (%p658_p8), %s456_s24, 1024  }
  0xde   : > { %742 = vsyncadd (%p658_p8), %s456_s24, 4294966272  ;;  %p13_p9 = scmp.ge.s32.totalorder %s806_s18, 4   ;;  %s976_s12 = smov %s749_s13 }
  0xdf   : > { %s977_s13 = smov %s753_s14  ;;  %s978_s14 = smov %s817_s21 }
  0xe0   : > { %s979_s15 = smov %s806_s18  ;;  %15 = sbr.rel (!%p13_p9) target bundleno = 3 (0x3), region = 67 }
  0xe5   :  { %462 = vsyncpa [#allocation3], 1 }
  0xe6   :  { %464 = vsyncpa [#allocation3 + $0x1], 1 }

</bundles_post_ra>
